<compile_context>
chip_gen: v7x
topology: tpu7x:2x2x1
jax: 0.10.0
libtpu: 0.0.40
codegen_flags: <defaults>
</compile_context>

<pallas_src>
import functools

import jax
import jax.numpy as jnp
import numpy as np
from jax.experimental import pallas as pl
from jax.experimental.pallas import tpu as pltpu

SELU_ALPHA = 1.6732632423543772
SELU_SCALE = 1.0507009873554804
NOISE_EPS = 1e-4

HPAD = 128      # padded width for the 100 / 75 / nb_regressors dims
TB_MAX = 512    # batch rows per grid step (multiple of 16 for bf16 sublanes)


def _round_up(x, m):
    return ((x + m - 1) // m) * m


def _selu(x):
    # SELU: scale * (x if x > 0 else alpha * (exp(x) - 1)); exp -> EUP slot.
    # exp argument clamped to <= 0 so the rejected branch never overflows.
    neg = SELU_ALPHA * (jnp.exp(jnp.minimum(x, 0.0)) - 1.0)
    return SELU_SCALE * jnp.where(x > 0, x, neg)


def _ae_kernel(x_ref,
               w1_ref, b1_ref,
               wzf_ref, bzf_ref,      # packed [z | fc] along the N dim
               whr_ref, bhr_ref,
               wrec_ref, brec_ref,
               rec_ref, reg_ref):
    # h1 = SELU(Linear(D -> 100))   (bf16 operands, f32 accumulate)
    h1 = _selu(jnp.dot(x_ref[...], w1_ref[...],
                       preferred_element_type=jnp.float32) + b1_ref[...])
    h1b = h1.astype(jnp.bfloat16)

    # One 256-wide matmul feeds both the bottleneck and the regression head:
    #   columns [0, HPAD)        -> z pre-activation   (Linear(100 -> 75))
    #   columns [HPAD, HPAD+NRp) -> regression head    (Linear(100 -> nb_regressors))
    zf = jnp.dot(h1b, wzf_ref[...],
                 preferred_element_type=jnp.float32) + bzf_ref[...]
    reg_ref[...] = zf[:, HPAD:].astype(reg_ref.dtype)
    z = _selu(zf[:, :HPAD])

    # decoder hidden: SELU(Linear(75 -> 100))
    hd = _selu(jnp.dot(z.astype(jnp.bfloat16), whr_ref[...],
                       preferred_element_type=jnp.float32) + bhr_ref[...])

    # reconstruction: Linear(100 -> D)
    rec_ref[...] = (jnp.dot(hd.astype(jnp.bfloat16), wrec_ref[...],
                            preferred_element_type=jnp.float32)
                    + brec_ref[...]).astype(rec_ref.dtype)


def init_params(key, input_size, nb_regressors, dtype=jnp.float32):
    """Deterministic synthetic parameters (PyTorch-style uniform fan-in init),
    stored unpadded in f32 as (in_features, out_features)."""
    D = int(np.prod(input_size))
    dims = [
        ("h1", D, 100),
        ("z", 100, 75),
        ("h1_r", 75, 100),
        ("reconstruction", 100, D),
        ("fc", 100, nb_regressors),
    ]
    params = {}
    for name, fan_in, fan_out in dims:
        key, kw, kb = jax.random.split(key, 3)
        bound = 1.0 / np.sqrt(fan_in)
        params[name + "_w"] = jax.random.uniform(
            kw, (fan_in, fan_out), dtype, minval=-bound, maxval=bound)
        params[name + "_b"] = jax.random.uniform(
            kb, (1, fan_out), dtype, minval=-bound, maxval=bound)
    return params


def _pad2d(a, rows, cols):
    return jnp.pad(a, ((0, rows - a.shape[0]), (0, cols - a.shape[1])))


def prepare_kernel_params(params, input_size, nb_regressors):
    """Pad every dim to a multiple of 128, pack z|fc, cast weights to bf16.

    Called ONCE (outside the jitted forward) so weight reshaping never sits on
    the per-call HBM path.
    """
    D = int(np.prod(input_size))
    Dp = _round_up(D, 128)
    NRp = _round_up(max(nb_regressors, 1), 128)

    wz = _pad2d(params["z_w"], HPAD, HPAD)
    wfc = _pad2d(params["fc_w"], HPAD, NRp)
    bz = _pad2d(params["z_b"], 1, HPAD)
    bfc = _pad2d(params["fc_b"], 1, NRp)

    return {
        "w1":   _pad2d(params["h1_w"], Dp, HPAD).astype(jnp.bfloat16),
        "b1":   _pad2d(params["h1_b"], 1, HPAD).astype(jnp.float32),
        "wzf":  jnp.concatenate([wz, wfc], axis=1).astype(jnp.bfloat16),
        "bzf":  jnp.concatenate([bz, bfc], axis=1).astype(jnp.float32),
        "whr":  _pad2d(params["h1_r_w"], HPAD, HPAD).astype(jnp.bfloat16),
        "bhr":  _pad2d(params["h1_r_b"], 1, HPAD).astype(jnp.float32),
        "wrec": _pad2d(params["reconstruction_w"], HPAD, Dp).astype(jnp.bfloat16),
        "brec": _pad2d(params["reconstruction_b"], 1, Dp).astype(jnp.float32),
    }


@functools.partial(jax.jit, static_argnames=("input_size", "nb_regressors"))
def semi_supervised_ae_forward(x, noise_key, kparams, *, input_size, nb_regressors):
    """Mirrors SemiSupervisedAE.forward (dropout is defined but unused there)."""
    B = x.shape[0]
    D = int(np.prod(input_size))
    Dp = _round_up(D, 128)
    NRp = _round_up(max(nb_regressors, 1), 128)
    NZF = HPAD + NRp

    # Batch padding / tiling: multiple of 16 rows (bf16 sublane packing),
    # <= TB_MAX rows per grid step, >= 2 parallel steps for medium batches so
    # the batch axis can shard across both TensorCores on v7x.
    Bp = _round_up(max(B, 1), 16)
    if Bp > TB_MAX:
        tb = TB_MAX
        Bp = _round_up(Bp, tb)
    elif Bp >= 64:
        tb = _round_up((Bp + 1) // 2, 16)
        Bp = _round_up(Bp, tb)
    else:
        tb = Bp
    grid = (Bp // tb,)

    # x = x + 0.0001 * randn_like(x); flatten; cast to bf16; pad.
    # All of this fuses into a single XLA pass producing the bf16 kernel input.
    noise = jax.random.normal(noise_key, x.shape, dtype=jnp.float32)
    x_flat = (x.astype(jnp.float32) + NOISE_EPS * noise).reshape(B, D)
    x_bf = x_flat.astype(jnp.bfloat16)
    if (Bp - B) or (Dp - D):
        x_bf = jnp.pad(x_bf, ((0, Bp - B), (0, Dp - D)))

    tile_rows = lambda i: (i, 0)   # streams over the batch tiles
    whole = lambda i: (0, 0)       # weights stay VMEM-resident (DMA'd once)

    # TODO(synk): for very large D (Dp >~ 32K) add a K-tiled w1 / N-tiled wrec
    # grid axis (or pl.Buffered(1) on the weight specs) to respect v7x's
    # smaller VMEM; irrelevant at the demo sizes (~0.6 MiB of weights).
    rec_pad, reg_pad = pl.pallas_call(
        _ae_kernel,
        out_shape=(
            jax.ShapeDtypeStruct((Bp, Dp), jnp.bfloat16),    # reconstruction (flat)
            jax.ShapeDtypeStruct((Bp, NRp), jnp.bfloat16),   # regression head (padded)
        ),
        grid_spec=pltpu.PrefetchScalarGridSpec(
            num_scalar_prefetch=0,
            grid=grid,
            in_specs=[
                pl.BlockSpec((tb, Dp), tile_rows),      # x (bf16)
                pl.BlockSpec((Dp, HPAD), whole),        # w1
                pl.BlockSpec((1, HPAD), whole),         # b1
                pl.BlockSpec((HPAD, NZF), whole),       # wzf  (z | fc packed)
                pl.BlockSpec((1, NZF), whole),          # bzf
                pl.BlockSpec((HPAD, HPAD), whole),      # whr
                pl.BlockSpec((1, HPAD), whole),         # bhr
                pl.BlockSpec((HPAD, Dp), whole),        # wrec
                pl.BlockSpec((1, Dp), whole),           # brec
            ],
            out_specs=(
                pl.BlockSpec((tb, Dp), tile_rows),
                pl.BlockSpec((tb, NRp), tile_rows),
            ),
        ),
        compiler_params=pltpu.CompilerParams(
            dimension_semantics=("parallel",)),
    )(
        x_bf,
        kparams["w1"], kparams["b1"],
        kparams["wzf"], kparams["bzf"],
        kparams["whr"], kparams["bhr"],
        kparams["wrec"], kparams["brec"],
    )

    # Row slice is cheap (Bp ~ B for large batches); column slice is a no-op
    # whenever D is already a multiple of 128 (demo: D = 1024).
    x_rec = rec_pad[:B, :D].reshape((B,) + tuple(input_size))
    x_reg = reg_pad[:B, :nb_regressors]
    return [x_rec, x_reg]


def _reference_forward(x, params, input_size, nb_regressors):
    """Pure-JAX f32 reference (no noise: the 1e-4 perturbation is covered by tolerance)."""
    B = x.shape[0]
    D = int(np.prod(input_size))
    xf = x.reshape(B, D).astype(jnp.float32)
    h1 = _selu(xf @ params["h1_w"] + params["h1_b"])
    reg = h1 @ params["fc_w"] + params["fc_b"]
    z = _selu(h1 @ params["z_w"] + params["z_b"])
    hd = _selu(z @ params["h1_r_w"] + params["h1_r_b"])
    rec = hd @ params["reconstruction_w"] + params["reconstruction_b"]
    return rec.reshape((-1,) + tuple(input_size)), reg


if __name__ == "__main__":
    input_size = (4, 16, 16)   # (C, H, W) -> D = 1024
    nb_regressors = 3
    B = 2

    key = jax.random.PRNGKey(0)
    key_params, key_x, key_noise = jax.random.split(key, 3)

    params = init_params(key_params, input_size, nb_regressors)
    kparams = prepare_kernel_params(params, input_size, nb_regressors)
    x = jax.random.normal(key_x, (B,) + input_size, dtype=jnp.float32)

    x_rec, x_reg = semi_supervised_ae_forward(
        x, key_noise, kparams, input_size=input_size, nb_regressors=nb_regressors)
    jax.block_until_ready((x_rec, x_reg))

    assert x_rec.shape == (B,) + input_size
    assert x_reg.shape == (B, nb_regressors)

    # Correctness vs pure-JAX f32 reference. Tolerance covers the 1e-4 input
    # noise plus bf16 I/O and bf16 matmul-operand rounding (f32 accumulation).
    ref_rec, ref_reg = _reference_forward(x, params, input_size, nb_regressors)
    rec_np = np.asarray(jnp.asarray(x_rec, dtype=jnp.float32))
    reg_np = np.asarray(jnp.asarray(x_reg, dtype=jnp.float32))
    np.testing.assert_allclose(rec_np, np.asarray(ref_rec), rtol=5e-2, atol=5e-2)
    np.testing.assert_allclose(reg_np, np.asarray(ref_reg), rtol=5e-2, atol=5e-2)

    print("KERNEL_OK")
</pallas_src>

<mosaic_0001>
module attributes {stable_mosaic.version = 11 : i64} {
  func.func @_ae_kernel(%arg0: i32, %arg1: memref<16x1024xbf16, #tpu.memory_space<vmem>>, %arg2: memref<1024x128xbf16, #tpu.memory_space<vmem>>, %arg3: memref<1x128xf32, #tpu.memory_space<vmem>>, %arg4: memref<128x256xbf16, #tpu.memory_space<vmem>>, %arg5: memref<1x256xf32, #tpu.memory_space<vmem>>, %arg6: memref<128x128xbf16, #tpu.memory_space<vmem>>, %arg7: memref<1x128xf32, #tpu.memory_space<vmem>>, %arg8: memref<128x1024xbf16, #tpu.memory_space<vmem>>, %arg9: memref<1x1024xf32, #tpu.memory_space<vmem>>, %arg10: memref<16x1024xbf16, #tpu.memory_space<vmem>>, %arg11: memref<16x128xbf16, #tpu.memory_space<vmem>>) attributes {dimension_semantics = [#tpu.dimension_semantics<parallel>], iteration_bounds = array<i64: 1>, scalar_prefetch = 0 : i64, scratch_operands = 0 : i64, tpu.core_type = #tpu.core_type<tc>, window_params = [{transform_indices = @transform_0, window_bounds = array<i64: 16, 1024>}, {pipeline_mode = #tpu.pipeline_mode<synchronous>, transform_indices = @transform_1, window_bounds = array<i64: 1024, 128>}, {pipeline_mode = #tpu.pipeline_mode<synchronous>, transform_indices = @transform_2, window_bounds = array<i64: 1, 128>}, {pipeline_mode = #tpu.pipeline_mode<synchronous>, transform_indices = @transform_3, window_bounds = array<i64: 128, 256>}, {pipeline_mode = #tpu.pipeline_mode<synchronous>, transform_indices = @transform_4, window_bounds = array<i64: 1, 256>}, {pipeline_mode = #tpu.pipeline_mode<synchronous>, transform_indices = @transform_5, window_bounds = array<i64: 128, 128>}, {pipeline_mode = #tpu.pipeline_mode<synchronous>, transform_indices = @transform_6, window_bounds = array<i64: 1, 128>}, {pipeline_mode = #tpu.pipeline_mode<synchronous>, transform_indices = @transform_7, window_bounds = array<i64: 128, 1024>}, {pipeline_mode = #tpu.pipeline_mode<synchronous>, transform_indices = @transform_8, window_bounds = array<i64: 1, 1024>}, {transform_indices = @transform_9, window_bounds = array<i64: 16, 1024>}, {transform_indices = @transform_10, window_bounds = array<i64: 16, 128>}]} {
    %c0 = arith.constant 0 : index
    %c0_0 = arith.constant 0 : index
    %0 = vector.load %arg1[%c0, %c0_0] : memref<16x1024xbf16, #tpu.memory_space<vmem>>, vector<16x1024xbf16>
    %c0_1 = arith.constant 0 : index
    %c0_2 = arith.constant 0 : index
    %1 = vector.load %arg2[%c0_1, %c0_2] : memref<1024x128xbf16, #tpu.memory_space<vmem>>, vector<1024x128xbf16>
    %cst = arith.constant dense<0.000000e+00> : vector<16x128xf32>
    %2 = tpu.matmul %0, %1, %cst {dimension_numbers = #tpu.dot_dimension_numbers<[1], [0], [0], [1], [0, 0, 1, 1], [], []>} : vector<16x1024xbf16>, vector<1024x128xbf16>, vector<16x128xf32> -> vector<16x128xf32>
    %c0_3 = arith.constant 0 : index
    %c0_4 = arith.constant 0 : index
    %3 = vector.load %arg3[%c0_3, %c0_4] : memref<1x128xf32, #tpu.memory_space<vmem>>, vector<1x128xf32>
    %4 = vector.broadcast %3 : vector<1x128xf32> to vector<16x128xf32>
    %5 = arith.addf %2, %4 : vector<16x128xf32>
    %cst_5 = arith.constant 0.000000e+00 : f32
    %6 = vector.broadcast %cst_5 : f32 to vector<16x128xf32>
    %7 = arith.minimumf %5, %6 : vector<16x128xf32>
    %8 = math.exp %7 : vector<16x128xf32>
    %cst_6 = arith.constant 1.000000e+00 : f32
    %9 = vector.broadcast %cst_6 : f32 to vector<16x128xf32>
    %10 = arith.subf %8, %9 : vector<16x128xf32>
    %cst_7 = arith.constant 1.67326319 : f32
    %11 = vector.broadcast %cst_7 : f32 to vector<16x128xf32>
    %12 = arith.mulf %11, %10 : vector<16x128xf32>
    %cst_8 = arith.constant 0.000000e+00 : f32
    %13 = vector.broadcast %cst_8 : f32 to vector<16x128xf32>
    %14 = arith.cmpf ogt, %5, %13 : vector<16x128xf32>
    %15 = arith.select %14, %5, %12 : vector<16x128xi1>, vector<16x128xf32>
    %cst_9 = arith.constant 1.05070102 : f32
    %16 = vector.broadcast %cst_9 : f32 to vector<16x128xf32>
    %17 = arith.mulf %16, %15 : vector<16x128xf32>
    %18 = arith.truncf %17 : vector<16x128xf32> to vector<16x128xbf16>
    %c0_10 = arith.constant 0 : index
    %c0_11 = arith.constant 0 : index
    %19 = vector.load %arg4[%c0_10, %c0_11] : memref<128x256xbf16, #tpu.memory_space<vmem>>, vector<128x256xbf16>
    %cst_12 = arith.constant dense<0.000000e+00> : vector<16x256xf32>
    %20 = tpu.matmul %18, %19, %cst_12 {dimension_numbers = #tpu.dot_dimension_numbers<[1], [0], [0], [1], [0, 0, 1, 1], [], []>} : vector<16x128xbf16>, vector<128x256xbf16>, vector<16x256xf32> -> vector<16x256xf32>
    %c0_13 = arith.constant 0 : index
    %c0_14 = arith.constant 0 : index
    %21 = vector.load %arg5[%c0_13, %c0_14] : memref<1x256xf32, #tpu.memory_space<vmem>>, vector<1x256xf32>
    %22 = vector.broadcast %21 : vector<1x256xf32> to vector<16x256xf32>
    %23 = arith.addf %20, %22 : vector<16x256xf32>
    %24 = vector.extract_strided_slice %23 {offsets = [0, 128], sizes = [16, 128], strides = [1, 1]} : vector<16x256xf32> to vector<16x128xf32>
    %25 = arith.truncf %24 : vector<16x128xf32> to vector<16x128xbf16>
    %c0_15 = arith.constant 0 : index
    %c0_16 = arith.constant 0 : index
    %26 = vector.load %arg11[%c0_15, %c0_16] : memref<16x128xbf16, #tpu.memory_space<vmem>>, vector<16x128xbf16>
    tpu.vector_store %arg11[%c0_15, %c0_16], %25 {strides = array<i32>} : memref<16x128xbf16, #tpu.memory_space<vmem>>, vector<16x128xbf16>,
    %27 = vector.extract_strided_slice %23 {offsets = [0, 0], sizes = [16, 128], strides = [1, 1]} : vector<16x256xf32> to vector<16x128xf32>
    %cst_17 = arith.constant 0.000000e+00 : f32
    %28 = vector.broadcast %cst_17 : f32 to vector<16x128xf32>
    %29 = arith.minimumf %27, %28 : vector<16x128xf32>
    %30 = math.exp %29 : vector<16x128xf32>
    %cst_18 = arith.constant 1.000000e+00 : f32
    %31 = vector.broadcast %cst_18 : f32 to vector<16x128xf32>
    %32 = arith.subf %30, %31 : vector<16x128xf32>
    %cst_19 = arith.constant 1.67326319 : f32
    %33 = vector.broadcast %cst_19 : f32 to vector<16x128xf32>
    %34 = arith.mulf %33, %32 : vector<16x128xf32>
    %cst_20 = arith.constant 0.000000e+00 : f32
    %35 = vector.broadcast %cst_20 : f32 to vector<16x128xf32>
    %36 = arith.cmpf ogt, %27, %35 : vector<16x128xf32>
    %37 = arith.select %36, %27, %34 : vector<16x128xi1>, vector<16x128xf32>
    %cst_21 = arith.constant 1.05070102 : f32
    %38 = vector.broadcast %cst_21 : f32 to vector<16x128xf32>
    %39 = arith.mulf %38, %37 : vector<16x128xf32>
    %40 = arith.truncf %39 : vector<16x128xf32> to vector<16x128xbf16>
    %c0_22 = arith.constant 0 : index
    %c0_23 = arith.constant 0 : index
    %41 = vector.load %arg6[%c0_22, %c0_23] : memref<128x128xbf16, #tpu.memory_space<vmem>>, vector<128x128xbf16>
    %cst_24 = arith.constant dense<0.000000e+00> : vector<16x128xf32>
    %42 = tpu.matmul %40, %41, %cst_24 {dimension_numbers = #tpu.dot_dimension_numbers<[1], [0], [0], [1], [0, 0, 1, 1], [], []>} : vector<16x128xbf16>, vector<128x128xbf16>, vector<16x128xf32> -> vector<16x128xf32>
    %c0_25 = arith.constant 0 : index
    %c0_26 = arith.constant 0 : index
    %43 = vector.load %arg7[%c0_25, %c0_26] : memref<1x128xf32, #tpu.memory_space<vmem>>, vector<1x128xf32>
    %44 = vector.broadcast %43 : vector<1x128xf32> to vector<16x128xf32>
    %45 = arith.addf %42, %44 : vector<16x128xf32>
    %cst_27 = arith.constant 0.000000e+00 : f32
    %46 = vector.broadcast %cst_27 : f32 to vector<16x128xf32>
    %47 = arith.minimumf %45, %46 : vector<16x128xf32>
    %48 = math.exp %47 : vector<16x128xf32>
    %cst_28 = arith.constant 1.000000e+00 : f32
    %49 = vector.broadcast %cst_28 : f32 to vector<16x128xf32>
    %50 = arith.subf %48, %49 : vector<16x128xf32>
    %cst_29 = arith.constant 1.67326319 : f32
    %51 = vector.broadcast %cst_29 : f32 to vector<16x128xf32>
    %52 = arith.mulf %51, %50 : vector<16x128xf32>
    %cst_30 = arith.constant 0.000000e+00 : f32
    %53 = vector.broadcast %cst_30 : f32 to vector<16x128xf32>
    %54 = arith.cmpf ogt, %45, %53 : vector<16x128xf32>
    %55 = arith.select %54, %45, %52 : vector<16x128xi1>, vector<16x128xf32>
    %cst_31 = arith.constant 1.05070102 : f32
    %56 = vector.broadcast %cst_31 : f32 to vector<16x128xf32>
    %57 = arith.mulf %56, %55 : vector<16x128xf32>
    %58 = arith.truncf %57 : vector<16x128xf32> to vector<16x128xbf16>
    %c0_32 = arith.constant 0 : index
    %c0_33 = arith.constant 0 : index
    %59 = vector.load %arg8[%c0_32, %c0_33] : memref<128x1024xbf16, #tpu.memory_space<vmem>>, vector<128x1024xbf16>
    %cst_34 = arith.constant dense<0.000000e+00> : vector<16x1024xf32>
    %60 = tpu.matmul %58, %59, %cst_34 {dimension_numbers = #tpu.dot_dimension_numbers<[1], [0], [0], [1], [0, 0, 1, 1], [], []>} : vector<16x128xbf16>, vector<128x1024xbf16>, vector<16x1024xf32> -> vector<16x1024xf32>
    %c0_35 = arith.constant 0 : index
    %c0_36 = arith.constant 0 : index
    %61 = vector.load %arg9[%c0_35, %c0_36] : memref<1x1024xf32, #tpu.memory_space<vmem>>, vector<1x1024xf32>
    %62 = vector.broadcast %61 : vector<1x1024xf32> to vector<16x1024xf32>
    %63 = arith.addf %60, %62 : vector<16x1024xf32>
    %64 = arith.truncf %63 : vector<16x1024xf32> to vector<16x1024xbf16>
    %c0_37 = arith.constant 0 : index
    %c0_38 = arith.constant 0 : index
    %65 = vector.load %arg10[%c0_37, %c0_38] : memref<16x1024xbf16, #tpu.memory_space<vmem>>, vector<16x1024xbf16>
    tpu.vector_store %arg10[%c0_37, %c0_38], %64 {strides = array<i32>} : memref<16x1024xbf16, #tpu.memory_space<vmem>>, vector<16x1024xbf16>,
    return
  }
  func.func @transform_0(%arg0: i32) -> (i32, i32) {
    %c0_i32 = arith.constant 0 : i32
    %c0_i32_0 = arith.constant 0 : i32
    return %arg0, %c0_i32 : i32, i32
  }
  func.func @transform_1(%arg0: i32) -> (i32, i32) {
    %c0_i32 = arith.constant 0 : i32
    %c0_i32_0 = arith.constant 0 : i32
    %c0_i32_1 = arith.constant 0 : i32
    return %c0_i32, %c0_i32_0 : i32, i32
  }
  func.func @transform_2(%arg0: i32) -> (i32, i32) {
    %c0_i32 = arith.constant 0 : i32
    %c0_i32_0 = arith.constant 0 : i32
    %c0_i32_1 = arith.constant 0 : i32
    return %c0_i32, %c0_i32_0 : i32, i32
  }
  func.func @transform_3(%arg0: i32) -> (i32, i32) {
    %c0_i32 = arith.constant 0 : i32
    %c0_i32_0 = arith.constant 0 : i32
    %c0_i32_1 = arith.constant 0 : i32
    return %c0_i32, %c0_i32_0 : i32, i32
  }
  func.func @transform_4(%arg0: i32) -> (i32, i32) {
    %c0_i32 = arith.constant 0 : i32
    %c0_i32_0 = arith.constant 0 : i32
    %c0_i32_1 = arith.constant 0 : i32
    return %c0_i32, %c0_i32_0 : i32, i32
  }
  func.func @transform_5(%arg0: i32) -> (i32, i32) {
    %c0_i32 = arith.constant 0 : i32
    %c0_i32_0 = arith.constant 0 : i32
    %c0_i32_1 = arith.constant 0 : i32
    return %c0_i32, %c0_i32_0 : i32, i32
  }
  func.func @transform_6(%arg0: i32) -> (i32, i32) {
    %c0_i32 = arith.constant 0 : i32
    %c0_i32_0 = arith.constant 0 : i32
    %c0_i32_1 = arith.constant 0 : i32
    return %c0_i32, %c0_i32_0 : i32, i32
  }
  func.func @transform_7(%arg0: i32) -> (i32, i32) {
    %c0_i32 = arith.constant 0 : i32
    %c0_i32_0 = arith.constant 0 : i32
    %c0_i32_1 = arith.constant 0 : i32
    return %c0_i32, %c0_i32_0 : i32, i32
  }
  func.func @transform_8(%arg0: i32) -> (i32, i32) {
    %c0_i32 = arith.constant 0 : i32
    %c0_i32_0 = arith.constant 0 : i32
    %c0_i32_1 = arith.constant 0 : i32
    return %c0_i32, %c0_i32_0 : i32, i32
  }
  func.func @transform_9(%arg0: i32) -> (i32, i32) {
    %c0_i32 = arith.constant 0 : i32
    %c0_i32_0 = arith.constant 0 : i32
    return %arg0, %c0_i32 : i32, i32
  }
  func.func @transform_10(%arg0: i32) -> (i32, i32) {
    %c0_i32 = arith.constant 0 : i32
    %c0_i32_0 = arith.constant 0 : i32
    return %arg0, %c0_i32 : i32, i32
  }
}

</mosaic_0001>

<bundles_post_ra>
// kernel: semi_supervised_ae_forward.1
= control target key start
LH: loop header
LB: loop body
LE: loop exit
PB: predicated region body
PF: predicated region fallthrough
CT: control target
= control target key end

     0   :  { %16 = vsyncpa [#allocation3], 0  ;;  %s2518_s0 = inlined_call_operand.vmem [shape: bf16[16,1024], index: 0, kind: input, shape index: {}]   ;;  %s2519_s1 = inlined_call_operand.hbm [shape: bf16[1024,128], index: 1, kind: input, shape index: {}]   ;;  %s2520_s2 = inlined_call_operand.vmem [shape: f32[1,128], index: 2, kind: input, shape index: {}]   ;;  %s2521_s3 = inlined_call_operand.vmem [shape: bf16[128,256], index: 3, kind: input, shape index: {}]   ;;  %s2522_s4 = inlined_call_operand.vmem [shape: f32[1,256], index: 4, kind: input, shape index: {}]   ;;  %s2523_s5 = inlined_call_operand.vmem [shape: bf16[128,128], index: 5, kind: input, shape index: {}]   ;;  %s2524_s6 = inlined_call_operand.vmem [shape: f32[1,128], index: 6, kind: input, shape index: {}]   ;;  %s2525_s7 = inlined_call_operand.hbm [shape: bf16[128,1024], index: 7, kind: input, shape index: {}]   ;;  %s2526_s8 = inlined_call_operand.vmem [shape: f32[1,1024], index: 8, kind: input, shape index: {}]   ;;  %s2527_s9 = inlined_call_operand.vmem [shape: bf16[16,1024], index: 9, kind: output, shape index: {0}]   ;;  %s2528_s10 = inlined_call_operand.vmem [shape: bf16[16,128], index: 10, kind: output, shape index: {1}]  }
   0x1   :  { %17 = vsyncpa [#allocation5], 0  ;;  %s2257_s13 = smov [#allocation2]   ;;  %s2209_s17 = scalar_lea.hbm %s2519_s1, 8192 }
   0x2   :  { %s25_s14 = sshll.u32 %s2257_s13, 4  ;;  %p2210_p0 = scmp.ne.s32.totalorder %s2519_s1, %s2209_s17  ;;  %s26_s14 = int_to_ptr.vmem [resolvable:$true] %s25_s14 }
   0x3   :  { %p2213_p1 = scmp.lt.u32.totalorder %s2209_s17, %s2519_s1 }
   0x5   :  { %p2215_p2 = pnand %p2213_p1, %p2210_p0 }
   0x7   :  { %2218 = shalt.err (!%p2215_p2)
}
   0x8   :  { %s2219_s22 = scalar_lea.vmem %s26_s14, 8192  ;;  %p2224_p4 = scmp.lt.s32.totalorder %s26_s14, %s26_s14 }
   0x9   :  { %p2220_p3 = scmp.ne.s32.totalorder %s26_s14, %s2219_s22  ;;  %p2225_p5 = scmp.lt.s32.totalorder %s2219_s22, %s2219_s22 }
   0xb   :  { %p2226_p6 = por %p2225_p5, %p2224_p4 }
   0xd   :  { %p2227_p7 = pnand %p2226_p6, %p2220_p3 }
   0xf   :  { %2230 = shalt.err (!%p2227_p7)
}
  0x10   :  { %s2258_s23 = smov 64   ;;  %s2259_s24 = smov 4  }
  0x11   :  { %31 = dma.hbm_to_vmem [thread:$0]  %s2519_s1, 8192, %s26_s14, [#allocation3], %s2258_s23, %s2258_s23, %s2259_s24  }
  0x12   :  { %s2260_s27 = smov [#allocation4]   ;;  %s2231_s11 = scalar_lea.hbm %s2525_s7, 8192 }
  0x13   :  { %s47_s28 = sshll.u32 %s2260_s27, 4  ;;  %p2232_p8 = scmp.ne.s32.totalorder %s2525_s7, %s2231_s11  ;;  %s48_s28 = int_to_ptr.vmem [resolvable:$true] %s47_s28 }
  0x14   :  { %p2235_p9 = scmp.lt.u32.totalorder %s2231_s11, %s2525_s7 }
  0x16   :  { %p2237_p10 = pnand %p2235_p9, %p2232_p8 }
  0x18   :  { %2240 = shalt.err (!%p2237_p10)
}
  0x19   :  { %s2241_s17 = scalar_lea.vmem %s48_s28, 8192  ;;  %p2246_p12 = scmp.lt.s32.totalorder %s48_s28, %s48_s28 }
  0x1a   :  { %p2242_p11 = scmp.ne.s32.totalorder %s48_s28, %s2241_s17  ;;  %p2247_p13 = scmp.lt.s32.totalorder %s2241_s17, %s2241_s17 }
  0x1c   :  { %p2248_p0 = por %p2247_p13, %p2246_p12 }
  0x1e   :  { %p2249_p1 = pnand %p2248_p0, %p2242_p11 }
  0x20   :  { %2252 = shalt.err (!%p2249_p1)
}
  0x21   :  { %s2261_s1 = smov 512   ;;  %s2262_s14 = smov 32  }
  0x22   :  { %53 = dma.hbm_to_vmem [thread:$0]  %s2525_s7, 8192, %s48_s28, [#allocation5], %s2261_s1, %s2261_s1, %s2262_s14  }
  0x23   :  { %2253 = dma.done.wait [#allocation3], 8192  }
  0x24   :  { %2254 = vsyncadd [#allocation3], 4294959104 }
  0x25   :  { %2255 = dma.done.wait [#allocation5], 8192  }
  0x26   :  { %2256 = vsyncadd [#allocation5], 4294959104  ;;  %v2101_v0 = vld [vmem:[#allocation2 + $0x40] sm:$0xff]   ;;  %v2105_v4 = vld [vmem:[#allocation2 + $0x48] sm:$0xff]   ;;  %vm2265_vm2 = vmmov 0  }
  0x27   :  { %v2102_v1 = vld [vmem:[#allocation2 + $0xc0] sm:$0xff]   ;;  %1975 = vmatprep.subr.bf16.mxu0 %v2101_v0  ;;  %v2106_v5 = vld [vmem:[#allocation2 + $0xc8] sm:$0xff]   ;;  %v2109_v8 = vld [vmem:[#allocation2 + $0x50] sm:$0xff]  }
  0x28   :  { %v2103_v2 = vld [vmem:[#allocation2] sm:$0xff]   ;;  %1997 = vmatprep.subr.bf16.mxu1 %v2102_v1  ;;  %v2107_v6 = vld [vmem:[#allocation2 + $0x8] sm:$0xff]   ;;  %v2110_v9 = vld [vmem:[#allocation2 + $0xd0] sm:$0xff]  }
  0x29   :  { %v2104_v3 = vld [vmem:[#allocation2 + $0x80] sm:$0xff]   ;;  %1976 = vmatpush3.bf16.msra.mxu0 %v2103_v2  ;;  %v2108_v7 = vld [vmem:[#allocation2 + $0x88] sm:$0xff]   ;;  %v2111_v10 = vld [vmem:[#allocation2 + $0x10] sm:$0xff]  }
  0x2a   :  { %1998 = vmatpush3.bf16.msra.mxu1 %v2104_v3  ;;  %1977 = vmatprep.subr.bf16.mxu0 %v2105_v4  ;;  %v2112_v11 = vld [vmem:[#allocation2 + $0x90] sm:$0xff]   ;;  %v2113_v12 = vld [vmem:[#allocation2 + $0x58] sm:$0xff]   ;;  %v2117_v16 = vld [vmem:[#allocation2 + $0x60] sm:$0xff]  }
  0x2b   :  { %1999 = vmatprep.subr.bf16.mxu1 %v2106_v5  ;;  %v2114_v13 = vld [vmem:[#allocation2 + $0xd8] sm:$0xff]   ;;  %v2118_v17 = vld [vmem:[#allocation2 + $0xe0] sm:$0xff]   ;;  %v2121_v20 = vld [vmem:[#allocation2 + $0x68] sm:$0xff]  }
  0x2c   :  { %v2115_v14 = vld [vmem:[#allocation2 + $0x18] sm:$0xff]   ;;  %v2119_v18 = vld [vmem:[#allocation2 + $0x20] sm:$0xff]   ;;  %v2122_v21 = vld [vmem:[#allocation2 + $0xe8] sm:$0xff]  }
  0x2d   :  { %1978 = vmatpush3.bf16.msra.mxu0 %v2107_v6  ;;  %v2116_v15 = vld [vmem:[#allocation2 + $0x98] sm:$0xff]   ;;  %v2120_v19 = vld [vmem:[#allocation2 + $0xa0] sm:$0xff]   ;;  %v2123_v22 = vld [vmem:[#allocation2 + $0x28] sm:$0xff]  }
  0x2e   :  { %2000 = vmatpush3.bf16.msra.mxu1 %v2108_v7  ;;  %1979 = vmatprep.subr.bf16.mxu0 %v2109_v8  ;;  %v2124_v23 = vld [vmem:[#allocation2 + $0xa8] sm:$0xff]   ;;  %v2125_v24 = vld [vmem:[#allocation2 + $0x70] sm:$0xff]   ;;  %v2129_v28 = vld [vmem:[#allocation2 + $0x78] sm:$0xff]  }
  0x2f   :  { %2001 = vmatprep.subr.bf16.mxu1 %v2110_v9  ;;  %v2126_v25 = vld [vmem:[#allocation2 + $0xf0] sm:$0xff]   ;;  %v2130_v29 = vld [vmem:[#allocation2 + $0xf8] sm:$0xff]   ;;  %v63_v32 = vld [vmem:[%s2518_s0] sm:$0xff] }
  0x30   :  { %v2127_v26 = vld [vmem:[#allocation2 + $0x30] sm:$0xff]   ;;  %v2131_v30 = vld [vmem:[#allocation2 + $0x38] sm:$0xff]   ;;  %v67_v33 = vld [vmem:[%s2518_s0 + $0x20] sm:$0xff] }
  0x31   :  { %1980 = vmatpush3.bf16.msra.mxu0 %v2111_v10  ;;  %v2128_v27 = vld [vmem:[#allocation2 + $0xb0] sm:$0xff]   ;;  %v2132_v31 = vld [vmem:[#allocation2 + $0xb8] sm:$0xff]   ;;  %v64_v34 = vld [vmem:[%s2518_s0 + $0x8] sm:$0xff]  ;;  %v1783_v35 = vcombine.low %v63_v32, %v67_v33  ;;  %v1784_v36 = vcombine.high %v63_v32, %v67_v33  ;;  %v2263_v32 = vmov 0  }
  0x32   :  { %2002 = vmatpush3.bf16.msra.mxu1 %v2112_v11  ;;  %1981 = vmatprep.subr.bf16.mxu0 %v2113_v12  ;;  %v68_v37 = vld [vmem:[%s2518_s0 + $0x28] sm:$0xff]  ;;  %v2133_v40 = vld [vmem:[#allocation2 + $0x140] sm:$0xff]   ;;  %v2141_v48 = vld [vmem:[#allocation2 + $0x150] sm:$0xff]  }
  0x33   :  { %2003 = vmatprep.subr.bf16.mxu1 %v2114_v13  ;;  %v1785_v38 = vcombine.low %v64_v34, %v68_v37  ;;  %v1786_v39 = vcombine.high %v64_v34, %v68_v37  ;;  %662 = vmatprep.mubr.bf16.mxu0 %v1784_v36  ;;  %v2134_v41 = vld [vmem:[#allocation2 + $0x1c0] sm:$0xff]   ;;  %v2137_v44 = vld [vmem:[#allocation2 + $0x148] sm:$0xff]   ;;  %v2142_v49 = vld [vmem:[#allocation2 + $0x1d0] sm:$0xff]   ;;  %v2264_v34 = vmov 0.0  }
  0x34   :  { %v2135_v42 = vld [vmem:[#allocation2 + $0x100] sm:$0xff]   ;;  %v2138_v45 = vld [vmem:[#allocation2 + $0x1c8] sm:$0xff]   ;;  %v2143_v50 = vld [vmem:[#allocation2 + $0x110] sm:$0xff]  }
  0x35   :  { %1982 = vmatpush3.bf16.msra.mxu0 %v2115_v14  ;;  %703 = vmatprep.mubr.bf16.mxu1 %v1786_v39  ;;  %v2136_v43 = vld [vmem:[#allocation2 + $0x180] sm:$0xff]   ;;  %v2139_v46 = vld [vmem:[#allocation2 + $0x108] sm:$0xff]   ;;  %v2144_v51 = vld [vmem:[#allocation2 + $0x190] sm:$0xff]  }
  0x36   :  { %2004 = vmatpush3.bf16.msra.mxu1 %v2116_v15  ;;  %1983 = vmatprep.subr.bf16.mxu0 %v2117_v16  ;;  %v2140_v47 = vld [vmem:[#allocation2 + $0x188] sm:$0xff]   ;;  %v2145_v52 = vld [vmem:[#allocation2 + $0x158] sm:$0xff]   ;;  %v2149_v56 = vld [vmem:[#allocation2 + $0x160] sm:$0xff]  }
  0x37   :  { %2005 = vmatprep.subr.bf16.mxu1 %v2118_v17  ;;  %v2146_v53 = vld [vmem:[#allocation2 + $0x1d8] sm:$0xff]   ;;  %v2150_v57 = vld [vmem:[#allocation2 + $0x1e0] sm:$0xff]   ;;  %v2153_v60 = vld [vmem:[#allocation2 + $0x168] sm:$0xff]  }
  0x38   :  { %v2147_v54 = vld [vmem:[#allocation2 + $0x118] sm:$0xff]   ;;  %v2151_v58 = vld [vmem:[#allocation2 + $0x120] sm:$0xff]   ;;  %v2154_v61 = vld [vmem:[#allocation2 + $0x1e8] sm:$0xff]  }
  0x39   :  { %1984 = vmatpush3.bf16.msra.mxu0 %v2119_v18  ;;  %v2148_v55 = vld [vmem:[#allocation2 + $0x198] sm:$0xff]   ;;  %v2152_v59 = vld [vmem:[#allocation2 + $0x1a0] sm:$0xff]   ;;  %v2155_v62 = vld [vmem:[#allocation2 + $0x128] sm:$0xff]  }
  0x3a   :  { %2006 = vmatpush3.bf16.msra.mxu1 %v2120_v19  ;;  %1985 = vmatprep.subr.bf16.mxu0 %v2121_v20  ;;  %v2156_v63 = vld [vmem:[#allocation2 + $0x1a8] sm:$0xff]   ;;  %v2157_v0 = vld [vmem:[#allocation2 + $0x170] sm:$0xff]   ;;  %v2161_v4 = vld [vmem:[#allocation2 + $0x178] sm:$0xff]  }
  0x3b   :  { %2007 = vmatprep.subr.bf16.mxu1 %v2122_v21  ;;  %v2158_v1 = vld [vmem:[#allocation2 + $0x1f0] sm:$0xff]   ;;  %v2162_v5 = vld [vmem:[#allocation2 + $0x1f8] sm:$0xff]   ;;  %v2167_v16 = vld [vmem:[%s2521_s3 + $0x4] ss:$8 sps:$4 sm:$0xff]  }
  0x3c   :  { %v2159_v2 = vld [vmem:[#allocation2 + $0x130] sm:$0xff]   ;;  %v2163_v6 = vld [vmem:[#allocation2 + $0x138] sm:$0xff]   ;;  %v2165_v17 = vld [vmem:[%s2521_s3] ss:$8 sps:$4 sm:$0xff]  }
  0x3d   :  { %1986 = vmatpush3.bf16.msra.mxu0 %v2123_v22  ;;  %v2160_v3 = vld [vmem:[#allocation2 + $0x1b0] sm:$0xff]   ;;  %v2164_v7 = vld [vmem:[#allocation2 + $0x1b8] sm:$0xff]   ;;  %v2173_v20 = vld [vmem:[%s2521_s3 + $0x24] ss:$8 sps:$4 sm:$0xff]  }
  0x3e   :  { %2008 = vmatpush3.bf16.msra.mxu1 %v2124_v23  ;;  %1987 = vmatprep.subr.bf16.mxu0 %v2125_v24  ;;  %v65_v8 = vld [vmem:[%s2518_s0 + $0x10] sm:$0xff]  ;;  %v66_v12 = vld [vmem:[%s2518_s0 + $0x18] sm:$0xff]  ;;  %v2171_v21 = vld [vmem:[%s2521_s3 + $0x20] ss:$8 sps:$4 sm:$0xff]  }
  0x3f   :  { %2009 = vmatprep.subr.bf16.mxu1 %v2126_v25  ;;  %v69_v9 = vld [vmem:[%s2518_s0 + $0x30] sm:$0xff]  ;;  %v70_v13 = vld [vmem:[%s2518_s0 + $0x38] sm:$0xff]  ;;  %v2179_v24 = vld [vmem:[%s2521_s3 + $0x44] ss:$8 sps:$4 sm:$0xff]  }
  0x40   :  { %v1787_v10 = vcombine.low %v65_v8, %v69_v9  ;;  %v1788_v11 = vcombine.high %v65_v8, %v69_v9  ;;  %v1789_v14 = vcombine.low %v66_v12, %v70_v13  ;;  %v1790_v15 = vcombine.high %v66_v12, %v70_v13  ;;  %v2170_v18 = vld [vmem:[%s2521_s3 + $0x14] ss:$8 sps:$4 sm:$0xff]   ;;  %v2168_v19 = vld [vmem:[%s2521_s3 + $0x10] ss:$8 sps:$4 sm:$0xff]   ;;  %v2177_v25 = vld [vmem:[%s2521_s3 + $0x40] ss:$8 sps:$4 sm:$0xff]  }
  0x41   :  { %1988 = vmatpush3.bf16.msra.mxu0 %v2127_v26  ;;  %v2176_v22 = vld [vmem:[%s2521_s3 + $0x34] ss:$8 sps:$4 sm:$0xff]   ;;  %v2174_v23 = vld [vmem:[%s2521_s3 + $0x30] ss:$8 sps:$4 sm:$0xff]   ;;  %v2189_v33 = vld [vmem:[%s2523_s5] sm:$0xff]  }
  0x42   :  { %2010 = vmatpush3.bf16.msra.mxu1 %v2128_v27  ;;  %1989 = vmatprep.subr.bf16.mxu0 %v2129_v28  ;;  %v2182_v26 = vld [vmem:[%s2521_s3 + $0x54] ss:$8 sps:$4 sm:$0xff]   ;;  %v2180_v27 = vld [vmem:[%s2521_s3 + $0x50] ss:$8 sps:$4 sm:$0xff]   ;;  %v2185_v28 = vld [vmem:[%s2521_s3 + $0x64] ss:$8 sps:$4 sm:$0xff]  }
  0x43   :  { %2011 = vmatprep.subr.bf16.mxu1 %v2130_v29  ;;  %v2183_v29 = vld [vmem:[%s2521_s3 + $0x60] ss:$8 sps:$4 sm:$0xff]  }
  0x44   :  { %v1782_v37 = vld [vmem:[%s2520_s2] ss:$0 sm:$0xff] }
  0x45   :  { %1990 = vmatpush3.bf16.msra.mxu0 %v2131_v30  ;;  %v2188_v30 = vld [vmem:[%s2521_s3 + $0x74] ss:$8 sps:$4 sm:$0xff]  }
  0x46   :  { %2012 = vmatpush3.bf16.msra.mxu1 %v2132_v31  ;;  %2019 = vmatprep.subr.bf16.mxu0 %v2133_v40  ;;  %v2186_v31 = vld [vmem:[%s2521_s3 + $0x70] ss:$8 sps:$4 sm:$0xff]  }
  0x47   :  { %2041 = vmatprep.subr.bf16.mxu1 %v2134_v41 }
  0x48   :  { %663 = vmatmul.mubr.bf16.vlgmr.msra.gmra.mrb[0].mxu0 %v1783_v35 }
  0x49   :  { %704 = vmatmul.mubr.bf16.vlgmr.msra.gmra.mrb[0].mxu1 %v1785_v38  ;;  %2020 = vmatpush3.bf16.msra.mxu0 %v2135_v42 }
  0x4a   :  { %2042 = vmatpush3.bf16.msra.mxu1 %v2136_v43  ;;  %2021 = vmatprep.subr.bf16.mxu0 %v2137_v44 }
  0x4b   :  { %2043 = vmatprep.subr.bf16.mxu1 %v2138_v45  ;;  %744 = vmatprep.mubr.bf16.mxu0 %v1788_v11 }
  0x4c   :  { %785 = vmatprep.mubr.bf16.mxu1 %v1790_v15 }
  0x4d   :  { %2022 = vmatpush3.bf16.msra.mxu0 %v2139_v46 }
  0x4e   :  { %2044 = vmatpush3.bf16.msra.mxu1 %v2140_v47  ;;  %2023 = vmatprep.subr.bf16.mxu0 %v2141_v48 }
  0x4f   :  { %2045 = vmatprep.subr.bf16.mxu1 %v2142_v49 }
  0x51   :  { %2024 = vmatpush3.bf16.msra.mxu0 %v2143_v50 }
  0x52   :  { %2046 = vmatpush3.bf16.msra.mxu1 %v2144_v51  ;;  %2025 = vmatprep.subr.bf16.mxu0 %v2145_v52 }
  0x53   :  { %2047 = vmatprep.subr.bf16.mxu1 %v2146_v53 }
  0x55   :  { %2026 = vmatpush3.bf16.msra.mxu0 %v2147_v54 }
  0x56   :  { %2048 = vmatpush3.bf16.msra.mxu1 %v2148_v55  ;;  %2027 = vmatprep.subr.bf16.mxu0 %v2149_v56 }
  0x57   :  { %2049 = vmatprep.subr.bf16.mxu1 %v2150_v57 }
  0x59   :  { %2028 = vmatpush3.bf16.msra.mxu0 %v2151_v58 }
  0x5a   :  { %2050 = vmatpush3.bf16.msra.mxu1 %v2152_v59  ;;  %2029 = vmatprep.subr.bf16.mxu0 %v2153_v60 }
  0x5b   :  { %2051 = vmatprep.subr.bf16.mxu1 %v2154_v61 }
  0x5d   :  { %2030 = vmatpush3.bf16.msra.mxu0 %v2155_v62 }
  0x5e   :  { %2052 = vmatpush3.bf16.msra.mxu1 %v2156_v63  ;;  %2031 = vmatprep.subr.bf16.mxu0 %v2157_v0 }
  0x5f   :  { %2053 = vmatprep.subr.bf16.mxu1 %v2158_v1 }
  0x61   :  { %2032 = vmatpush3.bf16.msra.mxu0 %v2159_v2 }
  0x62   :  { %2054 = vmatpush3.bf16.msra.mxu1 %v2160_v3  ;;  %2033 = vmatprep.subr.bf16.mxu0 %v2161_v4 }
  0x63   :  { %2055 = vmatprep.subr.bf16.mxu1 %v2162_v5 }
  0x65   :  { %2034 = vmatpush3.bf16.msra.mxu0 %v2163_v6 }
  0x66   :  { %2056 = vmatpush3.bf16.msra.mxu1 %v2164_v7  ;;  %919 = vmatprep.subr.bf16.mxu0 %v2167_v16 }
  0x67   :  { %2072 = vmatprep.subr.bf16.mxu1 %v2264_v34 }
  0x68   :  { %745 = vmatmul.mubr.bf16.vlgmr.msra.gmra.mrb[4].mxu0 %v1787_v10 }
  0x69   :  { %786 = vmatmul.mubr.bf16.vlgmr.msra.gmra.mrb[4].mxu1 %v1789_v14  ;;  %920 = vmatpush1.bf16.msra.mxu0 %v2165_v17 }
  0x6a   :  { %921 = vmatprep.subr.bf16.mxu0 %v2170_v18  ;;  %951 = vmatprep.mubr.bf16.mxu0 %v2263_v32 }
  0x6b   :  { %2073 = vmatpush3.bf16.msra.mxu1 %v2189_v33  ;;  %2088 = vmatprep.mubr.msk.bf16.mxu1 %vm2265_vm2, %v2264_v34 }
  0x6c   :  { %2074 = vmatprep.subr.bf16.mxu1 %v2264_v34 }
  0x6d   :  { %922 = vmatpush1.bf16.msra.mxu0 %v2168_v19  ;;  %v2190_v19 = vld [vmem:[%s2523_s5 + $0x8] sm:$0xff]  }
  0x6e   :  { %923 = vmatprep.subr.bf16.mxu0 %v2173_v20  ;;  %v2191_v20 = vld [vmem:[%s2523_s5 + $0x10] sm:$0xff]  }
  0x6f   :  { %2075 = vmatpush3.bf16.msra.mxu1 %v2190_v19  ;;  %v1146_v19 = vld [vmem:[#allocation4 + $0xe0] sm:$0xff] }
  0x70   :  { %2076 = vmatprep.subr.bf16.mxu1 %v2264_v34 }
  0x71   :  { %924 = vmatpush1.bf16.msra.mxu0 %v2171_v21  ;;  %v2192_v21 = vld [vmem:[%s2523_s5 + $0x18] sm:$0xff]  }
  0x72   :  { %925 = vmatprep.subr.bf16.mxu0 %v2176_v22  ;;  %v2193_v22 = vld [vmem:[%s2523_s5 + $0x20] sm:$0xff]  }
  0x73   :  { %2077 = vmatpush3.bf16.msra.mxu1 %v2191_v20  ;;  %v1143_v20 = vld [vmem:[#allocation4 + $0xc8] sm:$0xff] }
  0x74   :  { %2078 = vmatprep.subr.bf16.mxu1 %v2264_v34 }
  0x75   :  { %926 = vmatpush1.bf16.msra.mxu0 %v2174_v23  ;;  %v2194_v23 = vld [vmem:[%s2523_s5 + $0x28] sm:$0xff]  }
  0x76   :  { %927 = vmatprep.subr.bf16.mxu0 %v2179_v24  ;;  %v2195_v24 = vld [vmem:[%s2523_s5 + $0x30] sm:$0xff]  }
  0x77   :  { %2079 = vmatpush3.bf16.msra.mxu1 %v2192_v21 }
  0x78   :  { %2080 = vmatprep.subr.bf16.mxu1 %v2264_v34 }
  0x79   :  { %928 = vmatpush1.bf16.msra.mxu0 %v2177_v25  ;;  %v2196_v25 = vld [vmem:[%s2523_s5 + $0x38] sm:$0xff]  }
  0x7a   :  { %929 = vmatprep.subr.bf16.mxu0 %v2182_v26  ;;  %v1118_v26 = vld [vmem:[#allocation4] sm:$0xff] }
  0x7b   :  { %2081 = vmatpush3.bf16.msra.mxu1 %v2193_v22  ;;  %v1147_v22 = vld [vmem:[#allocation4 + $0xe8] sm:$0xff] }
  0x7c   :  { %2082 = vmatprep.subr.bf16.mxu1 %v2264_v34 }
  0x7d   :  { %930 = vmatpush1.bf16.msra.mxu0 %v2180_v27  ;;  %v1122_v27 = vld [vmem:[#allocation4 + $0x20] sm:$0xff] }
  0x7e   :  { %931 = vmatprep.subr.bf16.mxu0 %v2185_v28  ;;  %v1119_v28 = vld [vmem:[#allocation4 + $0x8] sm:$0xff] }
  0x7f   :  { %2083 = vmatpush3.bf16.msra.mxu1 %v2194_v23 }
  0x80   :  { %2084 = vmatprep.subr.bf16.mxu1 %v2264_v34 }
  0x81   :  { %932 = vmatpush1.bf16.msra.mxu0 %v2183_v29  ;;  %v1888_v29 = vcombine.low %v1118_v26, %v1122_v27 }
  0x82   :  { %933 = vmatprep.subr.bf16.mxu0 %v2188_v30  ;;  %v1889_v30 = vcombine.high %v1118_v26, %v1122_v27  ;;  %v1150_v26 = vld [vmem:[#allocation4 + $0x100] sm:$0xff] }
  0x83   :  { %2085 = vmatpush3.bf16.msra.mxu1 %v2195_v24  ;;  %v1914_v24 = vcombine.low %v1143_v20, %v1147_v22  ;;  %v1154_v27 = vld [vmem:[#allocation4 + $0x120] sm:$0xff] }
  0x84   :  { %2086 = vmatprep.subr.bf16.mxu1 %v2264_v34  ;;  %v827_v34 = vld [vmem:[%s2522_s4] sm:$0x3] }
  0x85   :  { %934 = vmatpush1.bf16.msra.mxu0 %v2186_v31  ;;  %v1123_v31 = vld [vmem:[#allocation4 + $0x28] sm:$0xff] }
  0x86   :  { %v1890_v33 = vcombine.low %v1119_v28, %v1123_v31  ;;  %1544 = vmatprep.subr.bf16.mxu0 %v1889_v30  ;;  %v1155_v30 = vld [vmem:[#allocation4 + $0x128] sm:$0xff] }
  0x87   :  { %2087 = vmatpush3.bf16.msra.mxu1 %v2196_v25  ;;  %v1915_v25 = vcombine.high %v1143_v20, %v1147_v22 }
 0x11b   :  { %v1991_v35 = vpop.f32.mrb[0].mxu0 }
 0x11c   :  { %v2013_v36 = vpop.f32.mrb[0].mxu1  ;;  %v1992_v38 = vpop.f32.mrb[1].mxu0 }
 0x11d   :  { %v1993_v39 = vadd.f32 %v1992_v38, %v1991_v35  ;;  %v2014_v40 = vpop.f32.mrb[1].mxu1  ;;  %v1994_v41 = vpop.f32.mrb[2].mxu0  ;;  %v1891_v35 = vcombine.high %v1119_v28, %v1123_v31  ;;  %v1151_v28 = vld [vmem:[#allocation4 + $0x108] sm:$0xff]  ;;  %v1920_v31 = vcombine.low %v1150_v26, %v1154_v27 }
 0x11e   :  { %v2015_v42 = vadd.f32 %v2014_v40, %v2013_v36  ;;  %v2016_v43 = vpop.f32.mrb[2].mxu1  ;;  %v1995_v44 = vpop.f32.mrb[3].mxu0  ;;  %v829_v36 = vlaneseq }
 0x11f   :  { %v665_v45 = vadd.f32 %v1993_v39, %v1782_v37  ;;  %v1996_v46 = vadd.f32 %v1995_v44, %v1994_v41  ;;  %v2017_v47 = vpop.f32.mrb[3].mxu1  ;;  %1587 = vmatprep.subr.bf16.mxu1 %v1891_v35  ;;  %v1923_v35 = vcombine.high %v1151_v28, %v1155_v30 }
 0x120   :  { %v2018_v48 = vadd.f32 %v2017_v47, %v2016_v43 }
 0x121   :  { %v706_v49 = vadd.f32 %v2015_v42, %v665_v45  ;;  %v668_v50 = vadd.f32 %v1996_v46, %v1782_v37  ;;  %v2455_v37 = vshrl.u32 %v829_v36, 7  ;;  %v1158_v36 = vld [vmem:[#allocation4 + $0x140] sm:$0xff] }
 0x123   :  { %v709_v51 = vadd.f32 %v2018_v48, %v668_v50  ;;  %v831_v38 = vsub.s32 0, %v2455_v37  ;;  %v835_v39 = vsub.s32 1, %v2455_v37 }
 0x125   :  { %v832_v40 = vrot.slane %v827_v34, %v831_v38  ;;  %v836_v42 = vrot.slane %v827_v34, %v835_v39  ;;  %v1162_v34 = vld [vmem:[#allocation4 + $0x160] sm:$0xff] }
 0x13b   :  { %v2035_v52 = vpop.f32.mrb[4].mxu0 }
 0x13c   :  { %v2057_v53 = vpop.f32.mrb[4].mxu1  ;;  %v2036_v54 = vpop.f32.mrb[5].mxu0 }
 0x13d   :  { %v2037_v55 = vadd.f32 %v2036_v54, %v2035_v52  ;;  %v2058_v56 = vpop.f32.mrb[5].mxu1  ;;  %v2038_v57 = vpop.f32.mrb[6].mxu0 }
 0x13e   :  { %v2059_v58 = vadd.f32 %v2058_v56, %v2057_v53  ;;  %v2060_v59 = vpop.f32.mrb[6].mxu1  ;;  %v2039_v60 = vpop.f32.mrb[7].mxu0 }
 0x13f   :  { %v747_v61 = vadd.f32 %v2037_v55, %v706_v49  ;;  %v2040_v62 = vadd.f32 %v2039_v60, %v2038_v57  ;;  %v2061_v63 = vpop.f32.mrb[7].mxu1 }
 0x140   :  { %v2062_v0 = vadd.f32 %v2061_v63, %v2060_v59 }
 0x141   :  { %v788_v1 = vadd.f32 %v2059_v58, %v747_v61  ;;  %v750_v2 = vadd.f32 %v2040_v62, %v709_v51 }
 0x143   :  { %v794_v3 = vmin.f32 %v788_v1, 0.0  ;;  %v791_v4 = vadd.f32 %v2062_v0, %v750_v2  ;;  %vm804_vm0 = vcmp.gt.f32.partialorder %v788_v1, 0.0  ;;  %v1126_v2 = vld [vmem:[#allocation4 + $0x40] sm:$0xff] }
 0x145   :  { %v796_v5 = vmul.f32 1.442695, %v794_v3  ;;  %v795_v6 = vmin.f32 %v791_v4, 0.0  ;;  %vm805_vm1 = vcmp.gt.f32.partialorder %v791_v4, 0.0  ;;  %v1130_v3 = vld [vmem:[#allocation4 + $0x60] sm:$0xff] }
 0x147   :  { %2197 = vpow2.f32 %v796_v5  ;;  %v798_v7 = vmul.f32 1.442695, %v795_v6  ;;  %v1897_v5 = vcombine.high %v1126_v2, %v1130_v3  ;;  %v1131_v6 = vld [vmem:[#allocation4 + $0x68] sm:$0xff] }
 0x149   :  { %2199 = vpow2.f32 %v798_v7  ;;  %v1896_v7 = vcombine.low %v1126_v2, %v1130_v3  ;;  %v1125_v3 = vld [vmem:[#allocation4 + $0x38] sm:$0xff] }
 0x151   :  { %v2198_v8 = vpop.eup %2197 }
 0x152   :  { %v1855_v9 = vadd.f32 -1.0, %v2198_v8 }
 0x153   :  { %v2200_v10 = vpop.eup %2199 }
 0x154   :  { %v802_v11 = vmul.f32 1.6732632, %v1855_v9  ;;  %v1856_v12 = vadd.f32 -1.0, %v2200_v10  ;;  %v1134_v10 = vld [vmem:[#allocation4 + $0x80] sm:$0xff] }
 0x156   :  { %v806_v13 = vsel %vm804_vm0, %v788_v1, %v802_v11  ;;  %v803_v14 = vmul.f32 1.6732632, %v1856_v12  ;;  %v1138_v11 = vld [vmem:[#allocation4 + $0xa0] sm:$0xff]  ;;  %v1135_v12 = vld [vmem:[#allocation4 + $0x88] sm:$0xff] }
 0x157   :  { %v808_v16 = vmul.f32 1.050701, %v806_v13  ;;  %v1905_v13 = vcombine.high %v1134_v10, %v1138_v11 }
 0x158   :  { %v807_v15 = vsel %vm805_vm1, %v791_v4, %v803_v14  ;;  %v1127_v4 = vld [vmem:[#allocation4 + $0x48] sm:$0xff] }
 0x159   :  { %v809_v17 = vmul.f32 1.050701, %v807_v15  ;;  %v1898_v8 = vcombine.low %v1127_v4, %v1131_v6  ;;  %v1899_v9 = vcombine.high %v1127_v4, %v1131_v6  ;;  %v1139_v14 = vld [vmem:[#allocation4 + $0xa8] sm:$0xff]  ;;  %v1904_v15 = vcombine.low %v1134_v10, %v1138_v11  ;;  %v1877_v6 = vld [vmem:[%s2524_s6] ss:$0 sm:$0xff] }
 0x15b   :  { %v810_v18 = vpack.c.bf16 %v809_v17, %v808_v16  ;;  %v1906_v16 = vcombine.low %v1135_v12, %v1139_v14  ;;  %v1907_v17 = vcombine.high %v1135_v12, %v1139_v14 }
 0x15d   :  { %952 = vmatmul.mubr.bf16.vlgmr.msra.gmra.mrb[8].mxu0 %v810_v18  ;;  %v1142_v18 = vld [vmem:[#allocation4 + $0xc0] sm:$0xff] }
 0x15e   :  { %1576 = vmatprep.mubr.bf16.mxu0 %v2263_v32  ;;  %1545 = vmatpush1.bf16.msra.mxu0 %v1888_v29  ;;  %v1913_v21 = vcombine.high %v1142_v18, %v1146_v19  ;;  %v1912_v23 = vcombine.low %v1142_v18, %v1146_v19  ;;  %v1921_v29 = vcombine.high %v1150_v26, %v1154_v27  ;;  %v1132_v26 = vld [vmem:[#allocation4 + $0x70] sm:$0xff]  ;;  %v1129_v27 = vld [vmem:[#allocation4 + $0x58] sm:$0xff] }
 0x15f   :  { %1546 = vmatprep.subr.bf16.mxu0 %v1897_v5 }
 0x162   :  { %1547 = vmatpush1.bf16.msra.mxu0 %v1896_v7 }
 0x163   :  { %1548 = vmatprep.subr.bf16.mxu0 %v1905_v13 }
 0x166   :  { %1549 = vmatpush1.bf16.msra.mxu0 %v1904_v15 }
 0x167   :  { %1550 = vmatprep.subr.bf16.mxu0 %v1913_v21 }
 0x16a   :  { %1551 = vmatpush1.bf16.msra.mxu0 %v1912_v23 }
 0x16b   :  { %1552 = vmatprep.subr.bf16.mxu0 %v1921_v29 }
 0x16e   :  { %1553 = vmatpush1.bf16.msra.mxu0 %v1920_v31 }
 0x230   :  { %v953_v41 = vpop.f32.mrb[8].mxu0 }
 0x231   :  { %v954_v43 = vadd.f32 %v953_v41, %v832_v40  ;;  %v955_v44 = vpop.f32.mrb[9].mxu0  ;;  %v1929_v41 = vcombine.high %v1158_v36, %v1162_v34 }
 0x232   :  { %v957_v45 = vpop.f32.mrb[10].mxu0  ;;  %v956_v49 = vadd.f32 %v955_v44, %v836_v42 }
 0x233   :  { %v972_v46 = vmin.f32 %v954_v43, 0.0  ;;  %v958_v47 = vadd.f32 %v957_v45, %v832_v40  ;;  %v959_v48 = vpop.f32.mrb[11].mxu0  ;;  %vm982_vm3 = vcmp.gt.f32.partialorder %v954_v43, 0.0  ;;  %v1159_v40 = vld [vmem:[#allocation4 + $0x148] sm:$0xff]  ;;  %1554 = vmatprep.subr.bf16.mxu0 %v1929_v41  ;;  %v1141_v41 = vld [vmem:[#allocation4 + $0xb8] sm:$0xff] }
 0x234   :  { %v960_v50 = vadd.f32 %v959_v48, %v836_v42  ;;  %v1163_v42 = vld [vmem:[#allocation4 + $0x168] sm:$0xff] }
 0x235   :  { %v974_v51 = vmul.f32 1.442695, %v972_v46  ;;  %v973_v52 = vmin.f32 %v958_v47, 0.0  ;;  %vm983_vm4 = vcmp.gt.f32.partialorder %v958_v47, 0.0  ;;  %v1930_v44 = vcombine.low %v1159_v40, %v1163_v42  ;;  %v1166_v46 = vld [vmem:[#allocation4 + $0x180] sm:$0xff]  ;;  %v1167_v48 = vld [vmem:[#allocation4 + $0x188] sm:$0xff] }
 0x236   :  { %v1973_v53 = vpack.c.bf16 %v960_v50, %v956_v49  ;;  %v1931_v45 = vcombine.high %v1159_v40, %v1163_v42  ;;  %v1171_v50 = vld [vmem:[#allocation4 + $0x1a8] sm:$0xff]  ;;  %v1137_v40 = vld [vmem:[#allocation4 + $0x98] sm:$0xff] }
 0x237   :  { %2201 = vpow2.f32 %v974_v51  ;;  %v976_v54 = vmul.f32 1.442695, %v973_v52  ;;  %v1938_v52 = vcombine.low %v1167_v48, %v1171_v50 }
 0x238   :  { %1974 = vst [vmem:[%s2528_s10] sm:$0xff] %v1973_v53   ;;  %v1939_v53 = vcombine.high %v1167_v48, %v1171_v50  ;;  %v1145_v48 = vld [vmem:[#allocation4 + $0xd8] sm:$0xff] }
 0x239   :  { %2203 = vpow2.f32 %v976_v54  ;;  %v1174_v54 = vld [vmem:[#allocation4 + $0x1c0] sm:$0xff] }
 0x241   :  { %v2202_v55 = vpop.eup %2201 }
 0x242   :  { %v1875_v56 = vadd.f32 -1.0, %v2202_v55  ;;  %v1178_v55 = vld [vmem:[#allocation4 + $0x1e0] sm:$0xff] }
 0x243   :  { %v2204_v57 = vpop.eup %2203 }
 0x244   :  { %v980_v58 = vmul.f32 1.6732632, %v1875_v56  ;;  %v1876_v59 = vadd.f32 -1.0, %v2204_v57  ;;  %v1175_v56 = vld [vmem:[#allocation4 + $0x1c8] sm:$0xff]  ;;  %v1945_v57 = vcombine.high %v1174_v54, %v1178_v55 }
 0x246   :  { %v984_v60 = vsel %vm982_vm3, %v954_v43, %v980_v58  ;;  %v981_v61 = vmul.f32 1.6732632, %v1876_v59  ;;  %v1928_v43 = vcombine.low %v1158_v36, %v1162_v34  ;;  %v1179_v58 = vld [vmem:[#allocation4 + $0x1e8] sm:$0xff]  ;;  %v1944_v59 = vcombine.low %v1174_v54, %v1178_v55  ;;  %v1136_v36 = vld [vmem:[#allocation4 + $0x90] sm:$0xff] }
 0x247   :  { %v986_v63 = vmul.f32 1.050701, %v984_v60  ;;  %v1946_v60 = vcombine.low %v1175_v56, %v1179_v58  ;;  %v1140_v34 = vld [vmem:[#allocation4 + $0xb0] sm:$0xff] }
 0x248   :  { %v985_v62 = vsel %vm983_vm4, %v958_v47, %v981_v61  ;;  %1555 = vmatpush1.bf16.msra.mxu0 %v1928_v43  ;;  %v1170_v47 = vld [vmem:[#allocation4 + $0x1a0] sm:$0xff]  ;;  %v1947_v61 = vcombine.high %v1175_v56, %v1179_v58  ;;  %v1908_v50 = vcombine.low %v1136_v36, %v1140_v34  ;;  %v1152_v54 = vld [vmem:[#allocation4 + $0x110] sm:$0xff]  ;;  %v1153_v56 = vld [vmem:[#allocation4 + $0x118] sm:$0xff] }
 0x249   :  { %v987_v0 = vmul.f32 1.050701, %v985_v62  ;;  %v1937_v49 = vcombine.high %v1166_v46, %v1170_v47  ;;  %v1936_v51 = vcombine.low %v1166_v46, %v1170_v47  ;;  %v1120_v62 = vld [vmem:[#allocation4 + $0x10] sm:$0xff] }
 0x24a   :  { %v1144_v46 = vld [vmem:[#allocation4 + $0xd0] sm:$0xff] }
 0x24b   :  { %v988_v1 = vpack.c.bf16 %v987_v0, %v986_v63  ;;  %1556 = vmatprep.subr.bf16.mxu0 %v1937_v49  ;;  %v1124_v63 = vld [vmem:[#allocation4 + $0x30] sm:$0xff]  ;;  %v1121_v0 = vld [vmem:[#allocation4 + $0x18] sm:$0xff] }
 0x24c   :  { %1557 = vmatpush1.bf16.msra.mxu0 %v1936_v51  ;;  %v1893_v2 = vcombine.high %v1120_v62, %v1124_v63  ;;  %v1894_v4 = vcombine.low %v1121_v0, %v1125_v3  ;;  %v1895_v5 = vcombine.high %v1121_v0, %v1125_v3  ;;  %v1148_v47 = vld [vmem:[#allocation4 + $0xf0] sm:$0xff]  ;;  %v1149_v49 = vld [vmem:[#allocation4 + $0xf8] sm:$0xff]  ;;  %v1910_v51 = vcombine.low %v1137_v40, %v1141_v41 }
 0x24d   :  { %2089 = vmatmul.mubr.bf16.vlgmr.msra.gmra.mrb[8].mxu1 %v988_v1  ;;  %1558 = vmatprep.subr.bf16.mxu0 %v1945_v57  ;;  %v1892_v1 = vcombine.low %v1120_v62, %v1124_v63  ;;  %v1156_v55 = vld [vmem:[#allocation4 + $0x130] sm:$0xff]  ;;  %v1157_v57 = vld [vmem:[#allocation4 + $0x138] sm:$0xff]  ;;  %v1916_v58 = vcombine.low %v1144_v46, %v1148_v47 }
 0x24e   :  { %1588 = vmatpush1.bf16.msra.mxu1 %v1890_v33  ;;  %1619 = vmatprep.mubr.bf16.mxu1 %v2263_v32  ;;  %v1922_v33 = vcombine.low %v1151_v28, %v1155_v30  ;;  %v1133_v28 = vld [vmem:[#allocation4 + $0x78] sm:$0xff]  ;;  %v1164_v62 = vld [vmem:[#allocation4 + $0x170] sm:$0xff] }
 0x24f   :  { %1589 = vmatprep.subr.bf16.mxu1 %v1899_v9  ;;  %v1902_v43 = vcombine.low %v1129_v27, %v1133_v28  ;;  %v1161_v63 = vld [vmem:[#allocation4 + $0x158] sm:$0xff] }
 0x250   :  { %1559 = vmatpush1.bf16.msra.mxu0 %v1944_v59  ;;  %v1918_v59 = vcombine.low %v1145_v48, %v1149_v49  ;;  %v1165_v0 = vld [vmem:[#allocation4 + $0x178] sm:$0xff] }
 0x251   :  { %1630 = vmatprep.subr.bf16.mxu0 %v1893_v2  ;;  %v1926_v2 = vcombine.low %v1153_v56, %v1157_v57 }
 0x252   :  { %1590 = vmatpush1.bf16.msra.mxu1 %v1898_v8 }
 0x253   :  { %1591 = vmatprep.subr.bf16.mxu1 %v1907_v17 }
 0x256   :  { %1592 = vmatpush1.bf16.msra.mxu1 %v1906_v16 }
 0x257   :  { %1593 = vmatprep.subr.bf16.mxu1 %v1915_v25 }
 0x25a   :  { %1594 = vmatpush1.bf16.msra.mxu1 %v1914_v24  ;;  %v1128_v24 = vld [vmem:[#allocation4 + $0x50] sm:$0xff] }
 0x25b   :  { %1595 = vmatprep.subr.bf16.mxu1 %v1923_v35  ;;  %v1903_v35 = vcombine.high %v1129_v27, %v1133_v28  ;;  %v1900_v42 = vcombine.low %v1128_v24, %v1132_v26 }
 0x25e   :  { %1596 = vmatpush1.bf16.msra.mxu1 %v1922_v33  ;;  %v1901_v33 = vcombine.high %v1128_v24, %v1132_v26  ;;  %v1182_v24 = vld [vmem:[%s2526_s8] sm:$0xff] }
 0x25f   :  { %1597 = vmatprep.subr.bf16.mxu1 %v1931_v45  ;;  %v1911_v45 = vcombine.high %v1137_v40, %v1141_v41  ;;  %v1187_v26 = vrot.slane %v1182_v24, %v831_v38  ;;  %v1191_v28 = vrot.slane %v1182_v24, %v835_v39 }
 0x262   :  { %1598 = vmatpush1.bf16.msra.mxu1 %v1930_v44  ;;  %v1909_v44 = vcombine.high %v1136_v36, %v1140_v34 }
 0x263   :  { %1599 = vmatprep.subr.bf16.mxu1 %v1939_v53  ;;  %v1919_v53 = vcombine.high %v1145_v48, %v1149_v49 }
 0x266   :  { %1600 = vmatpush1.bf16.msra.mxu1 %v1938_v52  ;;  %v1917_v52 = vcombine.high %v1144_v46, %v1148_v47 }
 0x267   :  { %1601 = vmatprep.subr.bf16.mxu1 %v1947_v61  ;;  %v1160_v61 = vld [vmem:[#allocation4 + $0x150] sm:$0xff] }
 0x268   :  { %v1933_v3 = vcombine.high %v1160_v61, %v1164_v62 }
 0x26a   :  { %1602 = vmatpush1.bf16.msra.mxu1 %v1946_v60  ;;  %v1925_v60 = vcombine.high %v1152_v54, %v1156_v55 }
 0x26b   :  { %1673 = vmatprep.subr.bf16.mxu1 %v1895_v5  ;;  %v1168_v5 = vld [vmem:[#allocation4 + $0x190] sm:$0xff] }
 0x320   :  { %v1094_v7 = vpop.f32.mrb[8].mxu1 }
 0x321   :  { %v1095_v8 = vadd.f32 %v1877_v6, %v1094_v7  ;;  %v2090_v9 = vpop.f32.mrb[9].mxu1  ;;  %v1169_v7 = vld [vmem:[#allocation4 + $0x198] sm:$0xff] }
 0x322   :  { %v1097_v10 = vpop.f32.mrb[10].mxu1  ;;  %v1932_v9 = vcombine.low %v1160_v61, %v1164_v62 }
 0x323   :  { %v1101_v11 = vmin.f32 %v1095_v8, 0.0  ;;  %v1098_v12 = vadd.f32 %v1877_v6, %v1097_v10  ;;  %v2091_v13 = vpop.f32.mrb[11].mxu1  ;;  %vm1111_vm5 = vcmp.gt.f32.partialorder %v1095_v8, 0.0  ;;  %v1172_v6 = vld [vmem:[#allocation4 + $0x1b0] sm:$0xff]  ;;  %v1934_v10 = vcombine.low %v1161_v63, %v1165_v0 }
 0x324   :  { %v1176_v13 = vld [vmem:[#allocation4 + $0x1d0] sm:$0xff] }
 0x325   :  { %v1103_v14 = vmul.f32 1.442695, %v1101_v11  ;;  %v1102_v15 = vmin.f32 %v1098_v12, 0.0  ;;  %vm1112_vm6 = vcmp.gt.f32.partialorder %v1098_v12, 0.0  ;;  %v1941_v11 = vcombine.high %v1168_v5, %v1172_v6 }
 0x327   :  { %2205 = vpow2.f32 %v1103_v14  ;;  %v1105_v16 = vmul.f32 1.442695, %v1102_v15  ;;  %v1180_v14 = vld [vmem:[#allocation4 + $0x1f0] sm:$0xff]  ;;  %v1177_v15 = vld [vmem:[#allocation4 + $0x1d8] sm:$0xff] }
 0x329   :  { %2207 = vpow2.f32 %v1105_v16  ;;  %v1181_v16 = vld [vmem:[#allocation4 + $0x1f8] sm:$0xff] }
 0x331   :  { %v2206_v17 = vpop.eup %2205 }
 0x332   :  { %v1886_v18 = vadd.f32 -1.0, %v2206_v17  ;;  %v1940_v17 = vcombine.low %v1168_v5, %v1172_v6 }
 0x333   :  { %v2208_v19 = vpop.eup %2207 }
 0x334   :  { %v1109_v20 = vmul.f32 1.6732632, %v1886_v18  ;;  %v1887_v21 = vadd.f32 -1.0, %v2208_v19  ;;  %v1949_v19 = vcombine.high %v1176_v13, %v1180_v14 }
 0x336   :  { %v1113_v22 = vsel %vm1111_vm5, %v1095_v8, %v1109_v20  ;;  %v1110_v23 = vmul.f32 1.6732632, %v1887_v21  ;;  %v1173_v8 = vld [vmem:[#allocation4 + $0x1b8] sm:$0xff]  ;;  %v1951_v20 = vcombine.high %v1177_v15, %v1181_v16  ;;  %v1948_v21 = vcombine.low %v1176_v13, %v1180_v14 }
 0x337   :  { %v1115_v29 = vmul.f32 1.050701, %v1113_v22  ;;  %v1942_v18 = vcombine.low %v1169_v7, %v1173_v8  ;;  %v1950_v22 = vcombine.low %v1177_v15, %v1181_v16 }
 0x338   :  { %v1114_v25 = vsel %vm1112_vm6, %v1098_v12, %v1110_v23  ;;  %v1943_v12 = vcombine.high %v1169_v7, %v1173_v8  ;;  %v1194_v23 = vsub.s32 2, %v2455_v37 }
 0x339   :  { %v1116_v30 = vmul.f32 1.050701, %v1114_v25  ;;  %v1198_v25 = vsub.s32 3, %v2455_v37 }
 0x33a   :  { %v1195_v27 = vrot.slane %v1182_v24, %v1194_v23 }
 0x33b   :  { %v2473_v31 = vpack.c.bf16 %v1116_v30, %v1115_v29  ;;  %v1199_v29 = vrot.slane %v1182_v24, %v1198_v25 }
 0x33d   :  { %1577 = vmatmul.mubr.bf16.vlgmr.msra.gmra.mrb[12].mxu0 %v2473_v31  ;;  %1620 = vmatmul.mubr.bf16.vlgmr.msra.gmra.mrb[12].mxu1 %v2473_v31 }
 0x33e   :  { %1631 = vmatpush1.bf16.msra.mxu0 %v1892_v1  ;;  %1674 = vmatpush1.bf16.msra.mxu1 %v1894_v4  ;;  %v1924_v1 = vcombine.low %v1152_v54, %v1156_v55  ;;  %v1935_v4 = vcombine.high %v1161_v63, %v1165_v0  ;;  %v1206_v54 = vsub.s32 5, %v2455_v37  ;;  %v1214_v55 = vsub.s32 7, %v2455_v37 }
 0x33f   :  { %1632 = vmatprep.subr.bf16.mxu0 %v1901_v33  ;;  %1675 = vmatprep.subr.bf16.mxu1 %v1903_v35 }
 0x340   :  { %1662 = vmatprep.mubr.bf16.mxu0 %v2263_v32  ;;  %1705 = vmatprep.mubr.bf16.mxu1 %v2263_v32  ;;  %v1927_v32 = vcombine.high %v1153_v56, %v1157_v57 }
 0x342   :  { %1633 = vmatpush1.bf16.msra.mxu0 %v1900_v42  ;;  %1676 = vmatpush1.bf16.msra.mxu1 %v1902_v43 }
 0x343   :  { %1634 = vmatprep.subr.bf16.mxu0 %v1909_v44  ;;  %1677 = vmatprep.subr.bf16.mxu1 %v1911_v45 }
 0x346   :  { %1635 = vmatpush1.bf16.msra.mxu0 %v1908_v50  ;;  %1678 = vmatpush1.bf16.msra.mxu1 %v1910_v51 }
 0x347   :  { %1636 = vmatprep.subr.bf16.mxu0 %v1917_v52  ;;  %1679 = vmatprep.subr.bf16.mxu1 %v1919_v53  ;;  %v1202_v52 = vsub.s32 4, %v2455_v37  ;;  %v1210_v53 = vsub.s32 6, %v2455_v37 }
 0x349   :  { %v1203_v56 = vrot.slane %v1182_v24, %v1202_v52  ;;  %v1211_v57 = vrot.slane %v1182_v24, %v1210_v53 }
 0x34a   :  { %1637 = vmatpush1.bf16.msra.mxu0 %v1916_v58  ;;  %1680 = vmatpush1.bf16.msra.mxu1 %v1918_v59  ;;  %v1207_v58 = vrot.slane %v1182_v24, %v1206_v54  ;;  %v1215_v59 = vrot.slane %v1182_v24, %v1214_v55 }
 0x34b   :  { %1638 = vmatprep.subr.bf16.mxu0 %v1925_v60  ;;  %1681 = vmatprep.subr.bf16.mxu1 %v1927_v32 }
 0x34e   :  { %1639 = vmatpush1.bf16.msra.mxu0 %v1924_v1  ;;  %1682 = vmatpush1.bf16.msra.mxu1 %v1926_v2 }
 0x34f   :  { %1640 = vmatprep.subr.bf16.mxu0 %v1933_v3  ;;  %1683 = vmatprep.subr.bf16.mxu1 %v1935_v4 }
 0x352   :  { %1641 = vmatpush1.bf16.msra.mxu0 %v1932_v9  ;;  %1684 = vmatpush1.bf16.msra.mxu1 %v1934_v10 }
 0x353   :  { %1642 = vmatprep.subr.bf16.mxu0 %v1941_v11  ;;  %1685 = vmatprep.subr.bf16.mxu1 %v1943_v12 }
 0x356   :  { %1643 = vmatpush1.bf16.msra.mxu0 %v1940_v17  ;;  %1686 = vmatpush1.bf16.msra.mxu1 %v1942_v18 }
 0x357   :  { %1644 = vmatprep.subr.bf16.mxu0 %v1949_v19  ;;  %1687 = vmatprep.subr.bf16.mxu1 %v1951_v20 }
 0x35a   :  { %1645 = vmatpush1.bf16.msra.mxu0 %v1948_v21  ;;  %1688 = vmatpush1.bf16.msra.mxu1 %v1950_v22 }
 0x35d   :  { %1663 = vmatmul.mubr.bf16.vlgmr.msra.gmra.mrb[16].mxu0 %v2473_v31  ;;  %1706 = vmatmul.mubr.bf16.vlgmr.msra.gmra.mrb[16].mxu1 %v2473_v31 }
 0x410   :  { %v1578_v30 = vpop.f32.mrb[12].mxu0  ;;  %v1621_v33 = vpop.f32.mrb[12].mxu1 }
 0x411   :  { %v1579_v35 = vadd.f32 %v1578_v30, %v1187_v26  ;;  %v1622_v31 = vadd.f32 %v1621_v33, %v1195_v27  ;;  %v1580_v36 = vpop.f32.mrb[13].mxu0  ;;  %v1623_v34 = vpop.f32.mrb[13].mxu1 }
 0x412   :  { %v1581_v40 = vadd.f32 %v1580_v36, %v1191_v28  ;;  %v1624_v41 = vadd.f32 %v1623_v34, %v1199_v29  ;;  %v1582_v42 = vpop.f32.mrb[14].mxu0  ;;  %v1625_v43 = vpop.f32.mrb[14].mxu1 }
 0x413   :  { %v1583_v44 = vadd.f32 %v1582_v42, %v1187_v26  ;;  %v1626_v45 = vadd.f32 %v1625_v43, %v1195_v27  ;;  %v1584_v46 = vpop.f32.mrb[15].mxu0  ;;  %v1627_v47 = vpop.f32.mrb[15].mxu1 }
 0x414   :  { %v1962_v38 = vpack.c.bf16 %v1581_v40, %v1579_v35  ;;  %v1963_v48 = vpack.c.bf16 %v1624_v41, %v1622_v31  ;;  %v1585_v49 = vadd.f32 %v1584_v46, %v1191_v28  ;;  %v1628_v50 = vadd.f32 %v1627_v47, %v1199_v29 }
 0x416   :  { %1764 = vst [vmem:[%s2527_s9] sm:$0xff] %v1962_v38  ;;  %1765 = vst [vmem:[%s2527_s9 + $0x8] sm:$0xff] %v1963_v48  ;;  %v1966_v39 = vpack.c.bf16 %v1585_v49, %v1583_v44  ;;  %v1967_v51 = vpack.c.bf16 %v1628_v50, %v1626_v45 }
 0x418   :  { %1768 = vst [vmem:[%s2527_s9 + $0x20] sm:$0xff] %v1966_v39  ;;  %1769 = vst [vmem:[%s2527_s9 + $0x28] sm:$0xff] %v1967_v51 }
 0x430   :  { %v1664_v60 = vpop.f32.mrb[16].mxu0  ;;  %v1707_v32 = vpop.f32.mrb[16].mxu1 }
 0x431   :  { %v1665_v61 = vadd.f32 %v1664_v60, %v1203_v56  ;;  %v1708_v62 = vadd.f32 %v1707_v32, %v1211_v57  ;;  %v1666_v63 = vpop.f32.mrb[17].mxu0  ;;  %v1709_v0 = vpop.f32.mrb[17].mxu1 }
 0x432   :  { %v1667_v1 = vadd.f32 %v1666_v63, %v1207_v58  ;;  %v1710_v2 = vadd.f32 %v1709_v0, %v1215_v59  ;;  %v1668_v3 = vpop.f32.mrb[18].mxu0  ;;  %v1711_v4 = vpop.f32.mrb[18].mxu1 }
 0x433   :  { %v1669_v5 = vadd.f32 %v1668_v3, %v1203_v56  ;;  %v1712_v6 = vadd.f32 %v1711_v4, %v1211_v57  ;;  %v1670_v7 = vpop.f32.mrb[19].mxu0  ;;  %v1713_v8 = vpop.f32.mrb[19].mxu1 }
 0x434   :  { %v1964_v9 = vpack.c.bf16 %v1667_v1, %v1665_v61  ;;  %v1965_v37 = vpack.c.bf16 %v1710_v2, %v1708_v62  ;;  %v1671_v10 = vadd.f32 %v1670_v7, %v1207_v58  ;;  %v1714_v11 = vadd.f32 %v1713_v8, %v1215_v59 }
 0x436   :  { %1766 = vst [vmem:[%s2527_s9 + $0x10] sm:$0xff] %v1964_v9  ;;  %1767 = vst [vmem:[%s2527_s9 + $0x18] sm:$0xff] %v1965_v37  ;;  %v1968_v12 = vpack.c.bf16 %v1671_v10, %v1669_v5  ;;  %v1969_v13 = vpack.c.bf16 %v1714_v11, %v1712_v6 }
 0x438   :  { %1770 = vst [vmem:[%s2527_s9 + $0x30] sm:$0xff] %v1968_v12  ;;  %1771 = vst [vmem:[%s2527_s9 + $0x38] sm:$0xff] %v1969_v13 }
 0x439   :  { %1780 = vsyncpa [#allocation3], 1 }
 0x43a   :  { %1781 = vsyncpa [#allocation5], 1 }

</bundles_post_ra>
